<compile_context>
chip_gen: v7x
topology: tpu7x:2x2x1
jax: 0.10.0
libtpu: 0.0.40
codegen_flags: <defaults>
</compile_context>

<pallas_src>
import jax
import jax.numpy as jnp
from jax.experimental import pallas as pl
from jax.experimental.pallas import tpu as pltpu


# ------------------------------ kernels -------------------------------------


def _rope_kernel_roll(cos_ref, sin_ref, q_ref, k_ref, q_out_ref, k_out_ref):
    # cos_ref: (TS, D) cos tile.  sin_ref: (TS, D) *sign-fused* sin tile.
    # q_ref / k_ref: (1, TS, H, D).
    cos = cos_ref[...][None, :, None, :]          # (1, TS, 1, D) — hoisted once
    sin_signed = sin_ref[...][None, :, None, :]
    half = q_ref.shape[-1] // 2

    def apply(x):
        # rotate_half(x) == roll(x, half, -1) * [-1]*half ++ [+1]*half; the sign
        # is folded into sin_signed, so the VPU does just 2 mul + 1 add per
        # element and the rotation rides the otherwise-idle XLU slot.
        return x * cos + pltpu.roll(x, shift=half, axis=3) * sin_signed

    q_out_ref[...] = apply(q_ref[...]).astype(q_out_ref.dtype)
    k_out_ref[...] = apply(k_ref[...]).astype(k_out_ref.dtype)


def _rope_kernel_concat(cos_ref, sin_ref, q_ref, k_ref, q_out_ref, k_out_ref):
    # Fallback when head_dim is not a multiple of 128 (lane-unaligned roll).
    # sin_ref here is the *plain* sin tile.
    cos = cos_ref[...][None, :, None, :]
    sin = sin_ref[...][None, :, None, :]
    half = q_ref.shape[-1] // 2

    def apply(x):
        x1 = x[..., :half]
        x2 = x[..., half:]
        rot = jnp.concatenate((-x2, x1), axis=-1)
        return x * cos + rot * sin

    q_out_ref[...] = apply(q_ref[...]).astype(q_out_ref.dtype)
    k_out_ref[...] = apply(k_ref[...]).astype(k_out_ref.dtype)


# ------------------------------ wrapper --------------------------------------


def _pick_seq_tile(S, H, D, itemsize, target_bytes=2 * 1024 * 1024):
    """Seq tile so a single (1, TS, H, D) q/k block is ~2 MiB.

    2 inputs + 2 outputs, each double-buffered => ~8 blocks live, i.e. ~16 MiB
    of VMEM — safe under the scoped-VMEM defaults on v5e/v6e/v7x while large
    enough to sit near the HBM roofline (per measured tiling data).
    """
    ts = max(1, target_bytes // max(1, H * D * itemsize))
    if ts >= S:
        return S
    # cos/sin block shape is (TS, D): TS must be a multiple of 8 (or == S).
    return max(8, (ts // 8) * 8)


def rotary_embedding(q: jax.Array, k: jax.Array, *, seq_tile: int | None = None):
    """Apply rotary position embedding to q and k.

    q, k: (B, S, H, D) with D even. Sequence length taken along dim 1
    (seq_dimension=1), exactly like the PyTorch module.
    """
    B, S, H, D = q.shape
    assert k.shape == (B, S, H, D), "q and k must share shape (B, S, H, D)"
    assert D % 2 == 0

    # --- glue: build cos/sin tables (same math as _update_cos_sin_tables) ---
    inv_freq = 1.0 / (10000.0 ** (jnp.arange(0, D, 2, dtype=jnp.float32) / D))
    t = jnp.arange(S, dtype=jnp.float32)
    freqs = jnp.einsum("i,j->ij", t, inv_freq)            # (S, D/2)
    emb = jnp.concatenate((freqs, freqs), axis=-1)        # (S, D)
    cos = jnp.cos(emb)
    sin = jnp.sin(emb)

    half = D // 2
    use_roll = (D % 128 == 0)
    if use_roll:
        # Fold the rotate_half sign pattern into the sin table so the kernel
        # only needs roll + 2 mul + 1 add.
        sign = jnp.concatenate(
            [-jnp.ones((half,), jnp.float32), jnp.ones((half,), jnp.float32)]
        )
        sin_table = sin * sign
        kernel = _rope_kernel_roll
    else:
        sin_table = sin
        kernel = _rope_kernel_concat

    # Cast tables to the activation dtype (table math stays in f32).
    cos = cos.astype(q.dtype)
    sin_table = sin_table.astype(q.dtype)

    itemsize = jnp.dtype(q.dtype).itemsize
    ts = seq_tile if seq_tile is not None else _pick_seq_tile(S, H, D, itemsize)
    ts = min(ts, S)

    grid = (B, pl.cdiv(S, ts))
    qk_spec = pl.BlockSpec((1, ts, H, D), lambda b, s: (b, s, 0, 0))
    cs_spec = pl.BlockSpec((ts, D), lambda b, s: (s, 0))

    # TODO(synk): for models with head_dim < 128, fold heads into the lane axis
    # (reshape to (B, S, H*D)) for lane-dense stores; not done here because the
    # per-head roll does not commute with that folding.

    q_out, k_out = pl.pallas_call(
        kernel,
        out_shape=(
            jax.ShapeDtypeStruct((B, S, H, D), q.dtype),
            jax.ShapeDtypeStruct((B, S, H, D), k.dtype),
        ),
        grid_spec=pltpu.PrefetchScalarGridSpec(
            num_scalar_prefetch=0,
            grid=grid,
            in_specs=[cs_spec, cs_spec, qk_spec, qk_spec],
            out_specs=[qk_spec, qk_spec],
        ),
        compiler_params=pltpu.CompilerParams(
            dimension_semantics=("parallel", "parallel"),
            vmem_limit_bytes=32 * 1024 * 1024,
        ),
    )(cos, sin_table, q, k)
    return q_out, k_out


# ------------------------------ reference ------------------------------------


def _reference(q, k):
    """Pure-JAX reference mirroring the PyTorch module, for sanity checking."""
    B, S, H, D = q.shape
    inv_freq = 1.0 / (10000.0 ** (jnp.arange(0, D, 2, dtype=jnp.float32) / D))
    t = jnp.arange(S, dtype=jnp.float32)
    freqs = jnp.einsum("i,j->ij", t, inv_freq)
    emb = jnp.concatenate((freqs, freqs), axis=-1)
    cos = jnp.cos(emb)[None, :, None, :]
    sin = jnp.sin(emb)[None, :, None, :]

    def rot_half(x):
        x1, x2 = jnp.split(x, 2, axis=-1)
        return jnp.concatenate((-x2, x1), axis=-1)

    return q * cos + rot_half(q) * sin, k * cos + rot_half(k) * sin


# ------------------------------ test -----------------------------------------


if __name__ == "__main__":
    key = jax.random.PRNGKey(0)
    k1, k2, k3, k4 = jax.random.split(key, 4)

    # Case 1: production-like head_dim = 128 -> pltpu.roll (XLU) fast path.
    B, S, H, D = 2, 16, 2, 128
    q = jax.random.normal(k1, (B, S, H, D), dtype=jnp.float32)
    k = jax.random.normal(k2, (B, S, H, D), dtype=jnp.float32)
    q_out, k_out = rotary_embedding(q, k)
    jax.block_until_ready((q_out, k_out))
    q_ref, k_ref = _reference(q, k)
    assert jnp.allclose(q_out, q_ref, atol=1e-5, rtol=1e-5)
    assert jnp.allclose(k_out, k_ref, atol=1e-5, rtol=1e-5)

    # Case 2: small head_dim = 32 (original toy shape) -> concat fallback path.
    B, S, H, D = 2, 8, 4, 32
    q = jax.random.normal(k3, (B, S, H, D), dtype=jnp.float32)
    k = jax.random.normal(k4, (B, S, H, D), dtype=jnp.float32)
    q_out, k_out = rotary_embedding(q, k)
    jax.block_until_ready((q_out, k_out))
    q_ref, k_ref = _reference(q, k)
    assert jnp.allclose(q_out, q_ref, atol=1e-5, rtol=1e-5)
    assert jnp.allclose(k_out, k_ref, atol=1e-5, rtol=1e-5)

    print("KERNEL_OK")
</pallas_src>

<mosaic_0001>
module attributes {stable_mosaic.version = 11 : i64} {
  func.func @_rope_kernel_roll(%arg0: i32, %arg1: i32, %arg2: memref<16x128xf32, #tpu.memory_space<vmem>>, %arg3: memref<16x128xf32, #tpu.memory_space<vmem>>, %arg4: memref<1x16x2x128xf32, #tpu.memory_space<vmem>>, %arg5: memref<1x16x2x128xf32, #tpu.memory_space<vmem>>, %arg6: memref<1x16x2x128xf32, #tpu.memory_space<vmem>>, %arg7: memref<1x16x2x128xf32, #tpu.memory_space<vmem>>) attributes {dimension_semantics = [#tpu.dimension_semantics<parallel>, #tpu.dimension_semantics<parallel>], iteration_bounds = array<i64: 2, 1>, scalar_prefetch = 0 : i64, scratch_operands = 0 : i64, tpu.core_type = #tpu.core_type<tc>, window_params = [{transform_indices = @transform_0, window_bounds = array<i64: 16, 128>}, {transform_indices = @transform_1, window_bounds = array<i64: 16, 128>}, {transform_indices = @transform_2, window_bounds = array<i64: 1, 16, 2, 128>}, {transform_indices = @transform_3, window_bounds = array<i64: 1, 16, 2, 128>}, {transform_indices = @transform_4, window_bounds = array<i64: 1, 16, 2, 128>}, {transform_indices = @transform_5, window_bounds = array<i64: 1, 16, 2, 128>}]} {
    %c0 = arith.constant 0 : index
    %c0_0 = arith.constant 0 : index
    %0 = vector.load %arg2[%c0, %c0_0] : memref<16x128xf32, #tpu.memory_space<vmem>>, vector<16x128xf32>
    %1 = vector.shape_cast %0 : vector<16x128xf32> to vector<1x16x1x128xf32>
    %c0_1 = arith.constant 0 : index
    %c0_2 = arith.constant 0 : index
    %2 = vector.load %arg3[%c0_1, %c0_2] : memref<16x128xf32, #tpu.memory_space<vmem>>, vector<16x128xf32>
    %3 = vector.shape_cast %2 : vector<16x128xf32> to vector<1x16x1x128xf32>
    %c0_3 = arith.constant 0 : index
    %c0_4 = arith.constant 0 : index
    %c0_5 = arith.constant 0 : index
    %c0_6 = arith.constant 0 : index
    %4 = vector.load %arg4[%c0_3, %c0_4, %c0_5, %c0_6] : memref<1x16x2x128xf32, #tpu.memory_space<vmem>>, vector<1x16x2x128xf32>
    %5 = vector.broadcast %1 : vector<1x16x1x128xf32> to vector<1x16x2x128xf32>
    %6 = arith.mulf %4, %5 : vector<1x16x2x128xf32>
    %c64_i32 = arith.constant 64 : i32
    %7 = tpu.dynamic_rotate %4 by %c64_i32 dim 3 : vector<1x16x2x128xf32>, i32 -> vector<1x16x2x128xf32>
    %8 = vector.broadcast %3 : vector<1x16x1x128xf32> to vector<1x16x2x128xf32>
    %9 = arith.mulf %7, %8 : vector<1x16x2x128xf32>
    %10 = arith.addf %6, %9 : vector<1x16x2x128xf32>
    %c0_7 = arith.constant 0 : index
    %c0_8 = arith.constant 0 : index
    %c0_9 = arith.constant 0 : index
    %c0_10 = arith.constant 0 : index
    %11 = vector.load %arg6[%c0_7, %c0_8, %c0_9, %c0_10] : memref<1x16x2x128xf32, #tpu.memory_space<vmem>>, vector<1x16x2x128xf32>
    tpu.vector_store %arg6[%c0_7, %c0_8, %c0_9, %c0_10], %10 {strides = array<i32>} : memref<1x16x2x128xf32, #tpu.memory_space<vmem>>, vector<1x16x2x128xf32>,
    %c0_11 = arith.constant 0 : index
    %c0_12 = arith.constant 0 : index
    %c0_13 = arith.constant 0 : index
    %c0_14 = arith.constant 0 : index
    %12 = vector.load %arg5[%c0_11, %c0_12, %c0_13, %c0_14] : memref<1x16x2x128xf32, #tpu.memory_space<vmem>>, vector<1x16x2x128xf32>
    %13 = vector.broadcast %1 : vector<1x16x1x128xf32> to vector<1x16x2x128xf32>
    %14 = arith.mulf %12, %13 : vector<1x16x2x128xf32>
    %c64_i32_15 = arith.constant 64 : i32
    %15 = tpu.dynamic_rotate %12 by %c64_i32_15 dim 3 : vector<1x16x2x128xf32>, i32 -> vector<1x16x2x128xf32>
    %16 = vector.broadcast %3 : vector<1x16x1x128xf32> to vector<1x16x2x128xf32>
    %17 = arith.mulf %15, %16 : vector<1x16x2x128xf32>
    %18 = arith.addf %14, %17 : vector<1x16x2x128xf32>
    %c0_16 = arith.constant 0 : index
    %c0_17 = arith.constant 0 : index
    %c0_18 = arith.constant 0 : index
    %c0_19 = arith.constant 0 : index
    %19 = vector.load %arg7[%c0_16, %c0_17, %c0_18, %c0_19] : memref<1x16x2x128xf32, #tpu.memory_space<vmem>>, vector<1x16x2x128xf32>
    tpu.vector_store %arg7[%c0_16, %c0_17, %c0_18, %c0_19], %18 {strides = array<i32>} : memref<1x16x2x128xf32, #tpu.memory_space<vmem>>, vector<1x16x2x128xf32>,
    return
  }
  func.func @transform_0(%arg0: i32, %arg1: i32) -> (i32, i32) {
    %c0_i32 = arith.constant 0 : i32
    %c0_i32_0 = arith.constant 0 : i32
    return %arg1, %c0_i32 : i32, i32
  }
  func.func @transform_1(%arg0: i32, %arg1: i32) -> (i32, i32) {
    %c0_i32 = arith.constant 0 : i32
    %c0_i32_0 = arith.constant 0 : i32
    return %arg1, %c0_i32 : i32, i32
  }
  func.func @transform_2(%arg0: i32, %arg1: i32) -> (i32, i32, i32, i32) {
    %c0_i32 = arith.constant 0 : i32
    %c0_i32_0 = arith.constant 0 : i32
    %c0_i32_1 = arith.constant 0 : i32
    return %arg0, %arg1, %c0_i32, %c0_i32_0 : i32, i32, i32, i32
  }
  func.func @transform_3(%arg0: i32, %arg1: i32) -> (i32, i32, i32, i32) {
    %c0_i32 = arith.constant 0 : i32
    %c0_i32_0 = arith.constant 0 : i32
    %c0_i32_1 = arith.constant 0 : i32
    return %arg0, %arg1, %c0_i32, %c0_i32_0 : i32, i32, i32, i32
  }
  func.func @transform_4(%arg0: i32, %arg1: i32) -> (i32, i32, i32, i32) {
    %c0_i32 = arith.constant 0 : i32
    %c0_i32_0 = arith.constant 0 : i32
    %c0_i32_1 = arith.constant 0 : i32
    return %arg0, %arg1, %c0_i32, %c0_i32_0 : i32, i32, i32, i32
  }
  func.func @transform_5(%arg0: i32, %arg1: i32) -> (i32, i32, i32, i32) {
    %c0_i32 = arith.constant 0 : i32
    %c0_i32_0 = arith.constant 0 : i32
    %c0_i32_1 = arith.constant 0 : i32
    return %arg0, %arg1, %c0_i32, %c0_i32_0 : i32, i32, i32, i32
  }
}

</mosaic_0001>

<bundles_post_ra>
// kernel: tpu_custom_call.1
= control target key start
LH: loop header
LB: loop body
LE: loop exit
PB: predicated region body
PF: predicated region fallthrough
CT: control target
= control target key end

     0   :  { %s2345_s0 = inlined_call_operand.hbm [shape: f32[16,128], index: 0, kind: input, shape index: {}]   ;;  %s2346_s1 = inlined_call_operand.hbm [shape: f32[16,128], index: 1, kind: input, shape index: {}]   ;;  %s2347_s2 = inlined_call_operand.hbm [shape: f32[2,16,2,128], index: 2, kind: input, shape index: {}]   ;;  %s2348_s3 = inlined_call_operand.hbm [shape: f32[2,16,2,128], index: 3, kind: input, shape index: {}]   ;;  %s2349_s4 = inlined_call_operand.hbm [shape: f32[2,16,2,128], index: 4, kind: output, shape index: {0}]   ;;  %s2350_s5 = inlined_call_operand.hbm [shape: f32[2,16,2,128], index: 5, kind: output, shape index: {1}]  }
   0x1   :  { %2373 = sst [smem:[#allocation28_spill]] %s2345_s0 }
   0x2   :  { %2374 = sst [smem:[#allocation29_spill]] %s2347_s2 }
   0x3   :  { %2375 = sst [smem:[#allocation30_spill]] %s2350_s5 }
   0x4   :  { %11 = vsyncpa [#allocation3], 0 }
   0x5   :  { %12 = vsyncpa [#allocation6], 0 }
   0x6   :  { %13 = vsyncpa [#allocation4], 0 }
   0x7   :  { %15 = vsyncpa [#allocation4 + $0x1], 0 }
   0x8   :  { %16 = vsyncpa [#allocation11], 0 }
   0x9   :  { %18 = vsyncpa [#allocation11 + $0x1], 0  ;;  %s1579_s18 = smov 0   ;;  %s1581_s19 = smov 0  }
   0xa   :  { %s1583_s20 = smov 0   ;;  %s1585_s21 = smov 0  }
   0xb   :  { %s1587_s22 = smov 0   ;;  %s1589_s23 = smov 0  }
   0xc LB: > { %2376 = sst [smem:[#allocation17_spill]] %s1513_s18  ;;  %s1610_s24 = sadd.s32 4294967295, %s1533_s23   ;;  %s1533_s23 = sphi %s1589_s23, %s24_s23   ;;  %s1529_s22 = sphi %s1587_s22, %s2429_s22   ;;  %s1525_s21 = sphi %s1585_s21, %s2428_s21   ;;  %s1521_s20 = sphi %s1583_s20, %s2424_s20   ;;  %s1517_s19 = sphi %s1581_s19, %s2427_s19   ;;  %s1513_s18 = sphi %s1579_s18, %s2426_s18  }
   0xd   : > { %2377 = sst [smem:[#allocation18_spill]] %s1521_s20  ;;  %s1160_s25 = sadd.s32 4294967294, %s1533_s23  }
   0xe   : > { %p104_p0 = scmp.ne.s32.totalorder %s1521_s20, %s1517_s19  ;;  %p105_p1 = scmp.eq.s32.totalorder %s1533_s23, 0 }
   0xf   : > { %p110_p2 = scmp.ne.s32.totalorder %s1517_s19, %s1513_s18  ;;  %p2351_p3 = scmp.eq.s32.totalorder %s1610_s24, 0 }
  0x10   : > { %p164_p4 = scmp.eq.s32.totalorder %s1610_s24, 1  ;;  %p1621_p5 = por %p105_p1, %p104_p0 }
  0x11   : > { %p170_p6 = scmp.eq.s32.totalorder %s1160_s25, 1  ;;  %p1627_p7 = por %p2351_p3, %p110_p2 }
  0x12   : > { %p1631_p8 = por %p164_p4, %p104_p0  ;;  %p1161_p10 = scmp.ge.s32.totalorder %s1533_s23, 1 }
  0x13   : > { %s2379_s28 = scalar_select %p1627_p7, 1, 0 }
  0x14   : > { %s2380_s29 = scalar_select %p1631_p8, 1, 0 }
  0x15   : > { %p1635_p9 = por %p170_p6, %p110_p2  ;;  %p205_p11 = scmp.lt.s32.totalorder %s1533_s23, 3 }
  0x16   : > { %2381 = sst [smem:[#allocation19_spill]] %s2380_s29  ;;  %s1535_s7 = smov [#allocation2]  }
  0x17   : > { %s2382_s30 = scalar_select %p1635_p9, 1, 0 }
  0x18   : > { %p1641_p12 = pnand %p1161_p10, %p205_p11  ;;  %s220_s8 = sshll.u32 %s1535_s7, 4  ;;  %s1645_s8 = int_to_ptr.vmem [resolvable:$true] %s220_s8 }
  0x19   : > { %2383 = sst [smem:[#allocation20_spill]] %s2382_s30  ;;  %p1229_p1 = scmp.lt.s32.totalorder %s1533_s23, 2 }
  0x1a   : > { %s2384_s6 = scalar_select %p1641_p12, 1, 0 }
  0x1b   : > { %p1206_p13 = pneg %p1641_p12  ;;  %p1659_p4 = pnand %p1229_p1, %p1621_p5 }
  0x1c   : > { %s36_s11 = sadd.s32 1, %s1529_s22  ;;  %s2388_s0 = sld [smem:[#allocation28_spill]] }
  0x1d   : > { %p1653_p2 = pnand %p1206_p13, %p2351_p3  ;;  %p1664_p6 = scmp.ge.s32.totalorder %s36_s11, 2 }
  0x1e   : > { %s2386_s10 = scalar_select %p1659_p4, 1, 0 }
  0x1f   : > { %p2360_p11 = pneg %p1653_p2 }
  0x22   : > { %s1295_s15 = scalar_lea.hbm %s2388_s0, 256 }
  0x23   : > { %p1296_p10 = scmp.ne.s32.totalorder %s2388_s0, %s1295_s15  ;;  %p1302_p1 = scmp.lt.u32.totalorder %s1295_s15, %s2388_s0 }
  0x25   : > { %p1298_p5 = pnand %p2360_p11, %p1296_p10 }
  0x27   : > { %p1299_p13 = pneg %p1298_p5 }
  0x29   : > { %p1304_p0 = pnand %p1302_p1, %p1299_p13 }
  0x2b   : > { %1307 = shalt.err (!%p1304_p0)
}
  0x2c   : > { %s1308_s7 = scalar_lea.vmem %s1645_s8, 256  ;;  %p1316_p7 = scmp.lt.s32.totalorder %s1645_s8, %s1645_s8 }
  0x2d   : > { %p1309_p3 = scmp.ne.s32.totalorder %s1645_s8, %s1308_s7  ;;  %p1317_p10 = scmp.lt.s32.totalorder %s1308_s7, %s1308_s7 }
  0x2f   : > { %p1311_p9 = pnand %p1309_p3, %p2360_p11  ;;  %p1318_p5 = por %p1317_p10, %p1316_p7 }
  0x31   : > { %p1312_p8 = pneg %p1311_p9 }
  0x33   : > { %p1319_p12 = pnand %p1318_p5, %p1312_p8 }
  0x35   : > { %1322 = shalt.err (!%p1319_p12)
}
  0x36   : > { %s2361_s13 = smov 128   ;;  %s2362_s14 = smov 8  }
  0x37   : > { %1209 = dma.hbm_to_vmem [thread:$0]  (!%p1653_p2), %s2388_s0, 256, %s1645_s8, [#allocation3], %s2361_s13, %s2361_s13, %s2362_s14  }
  0x38   : > { %s250_s17 = sand.u32 1, %s1533_s23   ;;  %s2431_s11 = smov (%p1664_p6, %s36_s11), 0 }
  0x39   : > { %2389 = sst [smem:[#allocation21_spill]] %s2431_s11  ;;  %s252_s25 = sand.u32 1, %s1521_s20  }
  0x3a   : > { %s92_s27 = ssub.s32 %s1529_s22, %s2431_s11  ;;  %s1706_s7 = sshll.u32 %s252_s25, 5 }
  0x3b   : > { %p95_p3 = scmp.eq.s32.totalorder %s92_s27, 0  ;;  %s1186_s26 = sshll.u32 %s1529_s22, 9 }
  0x3c   : > { %s254_s30 = scalar_lea.vmem [#allocation7], %s1706_s7  ;;  %s2390_s5 = sadd.s32 1, %s1521_s20 }
  0x3d   : > { %s263_s18 = sshll.u32 %s254_s30, 4  ;;  %s2392_s2 = sld [smem:[#allocation29_spill]]  ;;  %s1722_s18 = int_to_ptr.vmem [resolvable:$true] %s263_s18 }
  0x3e   : > { %s1713_s29 = scalar_select %p95_p3, %s1521_s20, %s2390_s5  }
  0x3f   : > { %s1724_s16 = scalar_lea.sflag [#allocation3], %s250_s17  ;;  %p2365_p8 = pneg %p1659_p4 }
  0x40   : > { %2391 = sst [smem:[#allocation22_spill]] %s1713_s29 }
  0x43   : > { %s1720_s12 = scalar_lea.hbm %s2392_s2, %s1186_s26  ;;  %s1328_s27 = scalar_lea.hbm %s2392_s2, 1024 }
  0x44   : > { %s1323_s25 = scalar_lea.hbm %s1720_s12, 512  ;;  %p1329_p0 = scmp.lt.u32.totalorder %s1720_s12, %s2392_s2 }
  0x45   : > { %p1324_p7 = scmp.ne.s32.totalorder %s1720_s12, %s1323_s25  ;;  %p1330_p6 = scmp.lt.u32.totalorder %s1328_s27, %s1323_s25 }
  0x46   : > { %p1332_p1 = scmp.lt.u32.totalorder %s1323_s25, %s1720_s12 }
  0x47   : > { %p1326_p9 = pnand %p2365_p8, %p1324_p7  ;;  %p1331_p13 = por %p1330_p6, %p1329_p0 }
  0x49   : > { %p1327_p12 = pneg %p1326_p9  ;;  %p1333_p10 = por %p1332_p1, %p1331_p13 }
  0x4b   : > { %p1334_p5 = pnand %p1333_p10, %p1327_p12 }
  0x4d   : > { %1337 = shalt.err (!%p1334_p5)
}
  0x4e   : > { %s1338_s17 = scalar_lea.vmem %s1722_s18, 512  ;;  %s1538_s5 = smov [#allocation7]  }
  0x4f   : > { %p1339_p3 = scmp.ne.s32.totalorder %s1722_s18, %s1338_s17  ;;  %s1343_s30 = sshll.u32 %s1538_s5, 4  ;;  %s1344_s30 = int_to_ptr.vmem [resolvable:$false] %s1343_s30 }
  0x50   : > { %s1345_s8 = scalar_lea.vmem %s1344_s30, 1024  ;;  %p1346_p11 = scmp.lt.s32.totalorder %s1722_s18, %s1344_s30 }
  0x51   : > { %p1341_p7 = pnand %p1339_p3, %p2365_p8  ;;  %p1347_p0 = scmp.lt.s32.totalorder %s1345_s8, %s1338_s17 }
  0x53   : > { %p1342_p9 = pneg %p1341_p7  ;;  %p1348_p6 = por %p1347_p0, %p1346_p11 }
  0x55   : > { %p1349_p13 = pnand %p1348_p6, %p1342_p9 }
  0x57   : > { %1352 = shalt.err (!%p1349_p13)
}
  0x58   : > { %s1539_s25 = smov 32   ;;  %s1540_s27 = smov 2  }
  0x59   : > { %1216 = dma.hbm_to_vmem [thread:$0]  (!%p1659_p4), %s1720_s12, 512, %s1722_s18, %s1724_s16, %s1539_s25, %s1539_s25, %s1540_s27  }
  0x5a   : > { %s1541_s15 = smov [#allocation5]   ;;  %s1760_s8 = scalar_lea.hbm %s2348_s3, %s1186_s26 }
  0x5b   : > { %s236_s5 = sshll.u32 %s1541_s15, 4  ;;  %s277_s13 = scalar_lea.vmem [#allocation8], %s1706_s7  ;;  %s237_s5 = int_to_ptr.vmem [resolvable:$true] %s236_s5 }
  0x5c   : > { %s286_s14 = sshll.u32 %s277_s13, 4  ;;  %s1353_s11 = scalar_lea.hbm %s2346_s1, 256  ;;  %s1786_s14 = int_to_ptr.vmem [resolvable:$true] %s286_s14 }
  0x5d   : > { %p1354_p11 = scmp.ne.s32.totalorder %s2346_s1, %s1353_s11  ;;  %p2393_p12 = pneg %p1653_p2 }
  0x5e   : > { %p1360_p5 = scmp.lt.u32.totalorder %s1353_s11, %s2346_s1 }
  0x5f   : > { %p1356_p1 = pnand %p1354_p11, %p2393_p12 }
  0x61   : > { %p1357_p10 = pneg %p1356_p1 }
  0x63   : > { %p1362_p3 = pnand %p1360_p5, %p1357_p10 }
  0x65   : > { %1365 = shalt.err (!%p1362_p3)
}
  0x66   : > { %s1366_s26 = scalar_lea.vmem %s237_s5, 256  ;;  %p2394_p9 = pmov %p2393_p12 }
  0x67   : > { %p1367_p7 = scmp.ne.s32.totalorder %s237_s5, %s1366_s26  ;;  %p1374_p13 = scmp.lt.s32.totalorder %s237_s5, %s237_s5 }
  0x68   : > { %p1375_p8 = scmp.lt.s32.totalorder %s1366_s26, %s1366_s26 }
  0x69   : > { %p1369_p0 = pnand %p1367_p7, %p2394_p9 }
  0x6a   : > { %p1376_p4 = por %p1375_p8, %p1374_p13 }
  0x6b   : > { %p1370_p6 = pneg %p1369_p0 }
  0x6d   : > { %p1377_p11 = pnand %p1376_p4, %p1370_p6 }
  0x6f   : > { %1380 = shalt.err (!%p1377_p11)
}
  0x70   : > { %s2395_s0 = smov 8   ;;  %s2396_s2 = smov 128  }
  0x71   : > { %1212 = dma.hbm_to_vmem [thread:$0]  (!%p1653_p2), %s2346_s1, 256, %s237_s5, [#allocation6], %s2396_s2, %s2396_s2, %s2395_s0  }
  0x72   : > { %s1381_s11 = scalar_lea.hbm %s1760_s8, 512  ;;  %p2397_p4 = scmp.ne.s32.totalorder %s2386_s10, 0 }
  0x73   : > { %p1382_p8 = scmp.ne.s32.totalorder %s1760_s8, %s1381_s11  ;;  %s1386_s7 = scalar_lea.hbm %s2348_s3, 1024 }
  0x74   : > { %p2398_p12 = pneg %p2397_p4  ;;  %p1387_p5 = scmp.lt.u32.totalorder %s1760_s8, %s2348_s3 }
  0x75   : > { %p1388_p3 = scmp.lt.u32.totalorder %s1386_s7, %s1381_s11  ;;  %p1390_p9 = scmp.lt.u32.totalorder %s1381_s11, %s1760_s8 }
  0x76   : > { %p1384_p1 = pnand %p1382_p8, %p2398_p12 }
  0x77   : > { %p1389_p7 = por %p1388_p3, %p1387_p5 }
  0x78   : > { %p1385_p10 = pneg %p1384_p1 }
  0x79   : > { %p1391_p2 = por %p1390_p9, %p1389_p7 }
  0x7b   : > { %p1392_p0 = pnand %p1391_p2, %p1385_p10 }
  0x7d   : > { %1395 = shalt.err (!%p1392_p0)
}
  0x7e   : > { %s1396_s5 = scalar_lea.vmem %s1786_s14, 512  ;;  %p2399_p13 = pmov %p2398_p12 }
  0x7f   : > { %p1397_p6 = scmp.ne.s32.totalorder %s1786_s14, %s1396_s5  ;;  %s1542_s30 = smov [#allocation8]  }
  0x80   : > { %s1401_s18 = sshll.u32 %s1542_s30, 4  ;;  %s1402_s18 = int_to_ptr.vmem [resolvable:$false] %s1401_s18 }
  0x81   : > { %p1399_p11 = pnand %p1397_p6, %p2399_p13  ;;  %s1403_s12 = scalar_lea.vmem %s1402_s18, 1024 }
  0x82   : > { %p1404_p12 = scmp.lt.s32.totalorder %s1786_s14, %s1402_s18  ;;  %p1405_p1 = scmp.lt.s32.totalorder %s1403_s12, %s1396_s5 }
  0x83   : > { %p1400_p8 = pneg %p1399_p11 }
  0x84   : > { %p1406_p5 = por %p1405_p1, %p1404_p12 }
  0x86   : > { %p1407_p3 = pnand %p1406_p5, %p1400_p8 }
  0x88   : > { %1410 = shalt.err (!%p1407_p3)
}
  0x89   : > { %1219 = dma.hbm_to_vmem [thread:$0]  (!%p2397_p4), %s1760_s8, 512, %s1786_s14, %s1724_s16, %s1539_s25, %s1539_s25, %s1540_s27  }
  0x8a   : > { %p2400_p10 = scmp.ne.s32.totalorder %s2384_s6, 0 }
  0x8c   : > { %298 = sbr.rel (%p2400_p10) target bundleno = 362 (0x16a), region = 36 }
  0x93   : > { %p2401_p7 = scmp.eq.s32.totalorder %s1610_s24, 0 }
  0x95   : > { %1492 = dma.done.wait (%p2401_p7), [#allocation3], 256   ;;  %p2402_p9 = pmov %p2401_p7 }
  0x96   : > { %p2403_p2 = pmov %p2401_p7 }
  0x97   : > { %1494 = vsyncadd (%p2402_p9), [#allocation3], 4294967040 }
  0x98   : > { %1496 = dma.done.wait (%p2403_p2), [#allocation6], 256   ;;  %p2404_p0 = pmov %p2403_p2 }
  0x99   : > { %s308_s10 = sand.u32 1, %s1610_s24   ;;  %s1827_s14 = sand.u32 1, %s1517_s19  }
  0x9a   : > { %1498 = vsyncadd (%p2404_p0), [#allocation6], 4294967040  ;;  %s1830_s6 = sshll.u32 %s1827_s14, 5  ;;  %s309_s16 = scalar_lea.sflag [#allocation3], %s308_s10 }
  0x9b   : > { %s1833_s25 = scalar_lea.vmem [#allocation7], %s1830_s6  ;;  %p2405_p4 = scmp.ne.s32.totalorder %s2379_s28, 0 }
  0x9d   : > { %1500 = dma.done.wait (%p2405_p4), %s309_s16, 1024  }
  0x9e   : > { %1502 = vsyncadd (%p2405_p4), %s309_s16, 4294966272  ;;  %v1840_v0 = vld [vmem:[%s1833_s25 + $0x4] sm:$0x3]  ;;  %v1843_v1 = vld [vmem:[%s1833_s25] sm:$0x3]  ;;  %s1543_s24 = smov 64   ;;  %v372_v34 = vlaneseq }
  0x9f   : > { %684 = vrot.lane.b32.xlu1 %v1840_v0, %s1543_s24  ;;  %680 = vrot.lane.b32.xlu0 %v1843_v1, %s1543_s24  ;;  %v1850_v2 = vld [vmem:[%s1833_s25 + $0x6] sm:$0x3]  ;;  %v1853_v3 = vld [vmem:[%s1833_s25 + $0x2] sm:$0x3]  ;;  %s321_s28 = scalar_lea.vmem [#allocation8], %s1830_s6  ;;  %v466_v39 = vld [vmem:[#allocation5] sm:$0xff] }
  0xa0   : > { %v1860_v4 = vld [vmem:[%s1833_s25 + $0xa] sm:$0x3]  ;;  %v1863_v5 = vld [vmem:[%s1833_s25 + $0x8] sm:$0x3]  ;;  %v1870_v6 = vld [vmem:[%s1833_s25 + $0xe] sm:$0x3]  ;;  %v470_v47 = vcombine.high %v466_v39, %v466_v39 }
  0xa1   : > { %v1873_v7 = vld [vmem:[%s1833_s25 + $0xc] sm:$0x3]  ;;  %v1880_v8 = vld [vmem:[%s1833_s25 + $0x12] sm:$0x3]  ;;  %v1883_v9 = vld [vmem:[%s1833_s25 + $0x10] sm:$0x3] }
  0xa2   : > { %v1890_v10 = vld [vmem:[%s1833_s25 + $0x16] sm:$0x3]  ;;  %v1893_v11 = vld [vmem:[%s1833_s25 + $0x14] sm:$0x3]  ;;  %v1900_v12 = vld [vmem:[%s1833_s25 + $0x1a] sm:$0x3] }
  0xa3   : > { %686 = vrot.lane.b32.xlu1 %v1850_v2, %s1543_s24  ;;  %682 = vrot.lane.b32.xlu0 %v1853_v3, %s1543_s24  ;;  %v1903_v13 = vld [vmem:[%s1833_s25 + $0x18] sm:$0x3]  ;;  %v1910_v14 = vld [vmem:[%s1833_s25 + $0x1e] sm:$0x3]  ;;  %v1544_v32 = vmov 1966171168  }
  0xa4   : > { %v1913_v15 = vld [vmem:[%s1833_s25 + $0x1c] sm:$0x3]  ;;  %v1920_v16 = vld [vmem:[%s321_s28 + $0x2] sm:$0x3]  ;;  %v1922_v17 = vld [vmem:[%s321_s28] sm:$0x3]  ;;  %v370_v33 = vunpack.c.l.s4 %v1544_v32 }
  0xa5   : > { %v1928_v18 = vld [vmem:[%s321_s28 + $0x6] sm:$0x3]  ;;  %v1930_v19 = vld [vmem:[%s321_s28 + $0x4] sm:$0x3]  ;;  %v1936_v20 = vld [vmem:[%s321_s28 + $0xa] sm:$0x3] }
  0xa6   : > { %v1938_v21 = vld [vmem:[%s321_s28 + $0x8] sm:$0x3]  ;;  %v1944_v22 = vld [vmem:[%s321_s28 + $0xe] sm:$0x3]  ;;  %v1946_v23 = vld [vmem:[%s321_s28 + $0xc] sm:$0x3]  ;;  %v371_v35 = vunpack.c.0.s8 %v370_v33 }
  0xa7   : > { %690 = vrot.lane.b32.xlu1 %v1860_v4, %s1543_s24  ;;  %688 = vrot.lane.b32.xlu0 %v1863_v5, %s1543_s24  ;;  %v1952_v24 = vld [vmem:[%s321_s28 + $0x12] sm:$0x3]  ;;  %v1954_v25 = vld [vmem:[%s321_s28 + $0x10] sm:$0x3]  ;;  %v373_v36 = vshrl.u32 %v372_v34, 7  ;;  %v364_v38 = vld [vmem:[#allocation2] sm:$0xff] }
  0xa8   : > { %v1960_v26 = vld [vmem:[%s321_s28 + $0x16] sm:$0x3]  ;;  %v1962_v27 = vld [vmem:[%s321_s28 + $0x14] sm:$0x3]  ;;  %v1968_v28 = vld [vmem:[%s321_s28 + $0x1a] sm:$0x3]  ;;  %v368_v42 = vcombine.high %v364_v38, %v364_v38 }
  0xa9   : > { %2406 = vst [vmem:[#allocation23_spill] sm:$0xff] %v1962_v27  ;;  %2407 = vst [vmem:[#allocation24_spill] sm:$0xff] %v1968_v28  ;;  %v1970_v29 = vld [vmem:[%s321_s28 + $0x18] sm:$0x3]  ;;  %v1976_v30 = vld [vmem:[%s321_s28 + $0x1e] sm:$0x3]  ;;  %v1984_v37 = vsub.s32 %v371_v35, %v373_v36 }
  0xaa   : > { %2408 = vst [vmem:[#allocation25_spill] sm:$0xff] %v1970_v29  ;;  %2409 = vst [vmem:[#allocation26_spill] sm:$0xff] %v1976_v30  ;;  %v1978_v31 = vld [vmem:[%s321_s28 + $0x1c] sm:$0x3]  ;;  %v1991_v49 = vsub.s32 0, %v373_v36  ;;  %v365_v52 = vld [vmem:[#allocation2 + $0x8] sm:$0xff] }
  0xab   : > { %694 = vrot.lane.b32.xlu1 %v1870_v6, %s1543_s24  ;;  %692 = vrot.lane.b32.xlu0 %v1873_v7, %s1543_s24  ;;  %2410 = vst [vmem:[#allocation27_spill] sm:$0xff] %v1978_v31  ;;  %v375_v40 = vrot.slane %v364_v38, %v1984_v37  ;;  %v477_v41 = vrot.slane %v466_v39, %v1984_v37  ;;  %v467_v33 = vld [vmem:[#allocation5 + $0x8] sm:$0xff]  ;;  %s2049_s27 = scalar_lea.vmem [#allocation9], %s1830_s6  ;;  %s1188_s8 = sshll.u32 %s1525_s21, 9 }
  0xac   : > { %v382_v48 = vrot.slane %v368_v42, %v1984_v37  ;;  %v484_v55 = vrot.slane %v470_v47, %v1984_v37  ;;  %v424_v60 = vrot.slane %v365_v52, %v1984_v37  ;;  %v417_v38 = vcombine.high %v365_v52, %v365_v52  ;;  %s973_s26 = sshll.u32 %s2049_s27, 4  ;;  %s2411_s20 = sld [smem:[#allocation19_spill]]  ;;  %s2187_s26 = int_to_ptr.vmem [resolvable:$true] %s973_s26 }
  0xad   : > { %v391_v43 = vrot.slane %v375_v40, %v1984_v37  ;;  %v383_v44 = vcombine.high %v375_v40, %v375_v40  ;;  %v493_v45 = vrot.slane %v477_v41, %v1984_v37  ;;  %v485_v46 = vcombine.high %v477_v41, %v477_v41  ;;  %s2185_s29 = scalar_lea.hbm %s2349_s4, %s1188_s8  ;;  %s953_s11 = scalar_lea.sflag [#allocation4], %s1827_s14 }
  0xae   : > { %v384_v56 = vcombine.high %v382_v48, %v382_v48  ;;  %v486_v32 = vcombine.high %v484_v55, %v484_v55  ;;  %v398_v36 = vrot.slane %v382_v48, %v1984_v37  ;;  %v432_v42 = vcombine.high %v424_v60, %v424_v60  ;;  %s1411_s9 = scalar_lea.vmem %s2187_s26, 512  ;;  %s1545_s13 = smov [#allocation9]  }
  0xaf   : > { %698 = vrot.lane.b32.xlu1 %v1880_v8, %s1543_s24  ;;  %696 = vrot.lane.b32.xlu0 %v1883_v9, %s1543_s24  ;;  %v413_v50 = vcombine.high %v391_v43, %v391_v43  ;;  %v405_v51 = vrot.slane %v383_v44, %v1984_v37  ;;  %v515_v53 = vcombine.high %v493_v45, %v493_v45  ;;  %p1412_p6 = scmp.ne.s32.totalorder %s2187_s26, %s1411_s9  ;;  %s1415_s7 = sshll.u32 %s1545_s13, 4  ;;  %s1416_s7 = int_to_ptr.vmem [resolvable:$false] %s1415_s7 }
  0xb0   : > { %v507_v54 = vrot.slane %v485_v46, %v1984_v37  ;;  %v2000_v58 = vrot.slane %v391_v43, %v1991_v49  ;;  %v2007_v62 = vrot.slane %v493_v45, %v1991_v49  ;;  %v412_v35 = vrot.slane %v384_v56, %v1984_v37  ;;  %s1417_s15 = scalar_lea.vmem %s1416_s7, 1024  ;;  %p1418_p12 = scmp.lt.s32.totalorder %s2187_s26, %s1416_s7 }
  0xb1   : > { %v1997_v57 = vrot.slane %v413_v50, %v1991_v49  ;;  %v415_v59 = vcombine.high %v405_v51, %v405_v51  ;;  %v2004_v61 = vrot.slane %v515_v53, %v1991_v49  ;;  %v2010_v34 = vrot.slane %v405_v51, %v1991_v49  ;;  %p1419_p1 = scmp.lt.s32.totalorder %s1417_s15, %s1411_s9 }
  0xb2   : > { %v517_v63 = vcombine.high %v507_v54, %v507_v54  ;;  %v664_v40 = vmul.f32 %v2000_v58, %v1843_v1  ;;  %v2022_v43 = vrot.slane %v424_v60, %v1984_v37  ;;  %v2025_v46 = vrot.slane %v507_v54, %v1991_v49  ;;  %p2412_p13 = scmp.ne.s32.totalorder %s2411_s20, 0 }
  0xb3   : > { %702 = vrot.lane.b32.xlu1 %v1890_v10, %s1543_s24  ;;  %700 = vrot.lane.b32.xlu0 %v1893_v11, %s1543_s24  ;;  %v666_v39 = vmul.f32 %v1997_v57, %v1840_v0  ;;  %v2019_v41 = vrot.slane %v415_v59, %v1991_v49  ;;  %v500_v47 = vrot.slane %v484_v55, %v1984_v37  ;;  %p1420_p5 = por %p1419_p1, %p1418_p12 }
  0xb4   : > { %v526_v48 = vrot.slane %v467_v33, %v1984_v37  ;;  %v2032_v50 = vrot.slane %v517_v63, %v1991_v49  ;;  %v514_v51 = vrot.slane %v486_v32, %v1984_v37  ;;  %v665_v52 = vmul.f32 %v2010_v34, %v1853_v3  ;;  %p1413_p11 = pnand %p1412_p6, %p2412_p13 }
  0xb5   : > { %v2038_v53 = vrot.slane %v412_v35, %v1991_v49  ;;  %v2041_v54 = vrot.slane %v398_v36, %v1991_v49  ;;  %v414_v55 = vcombine.high %v398_v36, %v398_v36  ;;  %v667_v56 = vmul.f32 %v2019_v41, %v1850_v2 }
  0xb6   : > { %v416_v59 = vcombine.high %v412_v35, %v412_v35  ;;  %v2046_v32 = vrot.slane %v500_v47, %v1991_v49  ;;  %v534_v3 = vcombine.high %v526_v48, %v526_v48  ;;  %v2056_v35 = vrot.slane %v514_v51, %v1991_v49  ;;  %p1414_p8 = pneg %p1413_p11 }
  0xb7   : > { %706 = vrot.lane.b32.xlu1 %v1900_v12, %s1543_s24  ;;  %704 = vrot.lane.b32.xlu0 %v1903_v13, %s1543_s24 }
  0xb8   : > { %p1421_p3 = pnand %p1420_p5, %p1414_p8 }
  0xbb   : > { %710 = vrot.lane.b32.xlu1 %v1910_v14, %s1543_s24  ;;  %708 = vrot.lane.b32.xlu0 %v1913_v15, %s1543_s24 }
  0xbf   : > { %874 = vrot.lane.b32.xlu1 %v1920_v16, %s1543_s24  ;;  %872 = vrot.lane.b32.xlu0 %v1922_v17, %s1543_s24 }
  0xc3   : > { %878 = vrot.lane.b32.xlu1 %v1928_v18, %s1543_s24  ;;  %876 = vrot.lane.b32.xlu0 %v1930_v19, %s1543_s24 }
  0xc7   : > { %882 = vrot.lane.b32.xlu1 %v1936_v20, %s1543_s24  ;;  %880 = vrot.lane.b32.xlu0 %v1938_v21, %s1543_s24 }
  0xcb   : > { %886 = vrot.lane.b32.xlu1 %v1944_v22, %s1543_s24  ;;  %884 = vrot.lane.b32.xlu0 %v1946_v23, %s1543_s24 }
  0xcf   : > { %890 = vrot.lane.b32.xlu1 %v1952_v24, %s1543_s24  ;;  %888 = vrot.lane.b32.xlu0 %v1954_v25, %s1543_s24 }
  0xd3   : > { %894 = vrot.lane.b32.xlu1 %v1960_v26, %s1543_s24  ;;  %892 = vrot.lane.b32.xlu0 %v1962_v27, %s1543_s24 }
  0xd7   : > { %898 = vrot.lane.b32.xlu1 %v1968_v28, %s1543_s24  ;;  %896 = vrot.lane.b32.xlu0 %v1970_v29, %s1543_s24 }
  0xdb   : > { %902 = vrot.lane.b32.xlu1 %v1976_v30, %s1543_s24  ;;  %900 = vrot.lane.b32.xlu0 %v1978_v31, %s1543_s24  ;;  %v516_v31 = vcombine.high %v500_v47, %v500_v47  ;;  %v519_v30 = vcombine.high %v467_v33, %v467_v33  ;;  %v2061_v33 = vrot.slane %v414_v55, %v1991_v49 }
  0xdc   : > { %v454_v47 = vrot.slane %v432_v42, %v1984_v37  ;;  %v556_v55 = vrot.slane %v534_v3, %v1984_v37  ;;  %v542_v42 = vrot.slane %v526_v48, %v1984_v37 }
  0xdd   : > { %v670_v3 = vmul.f32 %v2061_v33, %v1873_v7 }
  0xde   : > { %v2090_v48 = vrot.slane %v454_v47, %v1991_v49  ;;  %v2100_v7 = vrot.slane %v542_v42, %v1991_v49  ;;  %v564_v29 = vcombine.high %v542_v42, %v542_v42 }
  0xe0   : > { %v2119_v27 = vrot.slane %v564_v29, %v1991_v49 }
 0x111   : > { %v685_v44 = vpop.permute.xlu1 %684  ;;  %v681_v45 = vpop.permute.xlu0 %680 }
 0x112   : > { %v794_v0 = vmul.f32 %v2004_v61, %v685_v44  ;;  %v792_v1 = vmul.f32 %v2007_v62, %v681_v45 }
 0x114   : > { %v810_v60 = vadd.f32 %v794_v0, %v666_v39  ;;  %v808_v63 = vadd.f32 %v792_v1, %v664_v40  ;;  %v518_v39 = vcombine.high %v514_v51, %v514_v51  ;;  %v668_v40 = vmul.f32 %v2041_v54, %v1863_v5 }
 0x115   : > { %v687_v44 = vpop.permute.xlu1 %686  ;;  %v683_v45 = vpop.permute.xlu0 %682  ;;  %v431_v0 = vrot.slane %v417_v38, %v1984_v37  ;;  %v669_v1 = vmul.f32 %v2038_v53, %v1860_v4  ;;  %v2072_v51 = vrot.slane %v2022_v43, %v1991_v49  ;;  %v533_v38 = vrot.slane %v519_v30, %v1984_v37 }
 0x116   : > { %826 = vst [vmem:[%s2049_s27 + $0x4] sm:$0x3] %v810_v60  ;;  %824 = vst [vmem:[%s2049_s27] sm:$0x3] %v808_v63  ;;  %v795_v36 = vmul.f32 %v2032_v50, %v687_v44  ;;  %v793_v2 = vmul.f32 %v2025_v46, %v683_v45  ;;  %v2068_v60 = vrot.slane %v416_v59, %v1991_v49 }
 0x117   : > { %v464_v30 = vcombine.high %v454_v47, %v454_v47  ;;  %v447_v42 = vrot.slane %v431_v0, %v1984_v37 }
 0x118   : > { %v811_v63 = vadd.f32 %v795_v36, %v667_v56  ;;  %v809_v44 = vadd.f32 %v793_v2, %v665_v52  ;;  %v2082_v52 = vrot.slane %v518_v39, %v1991_v49  ;;  %v2085_v56 = vrot.slane %v516_v31, %v1991_v49 }
 0x119   : > { %v691_v5 = vpop.permute.xlu1 %690  ;;  %v689_v45 = vpop.permute.xlu0 %688  ;;  %v462_v36 = vcombine.high %v2022_v43, %v2022_v43  ;;  %v671_v2 = vmul.f32 %v2068_v60, %v1870_v6  ;;  %v2097_v31 = vrot.slane %v556_v55, %v1991_v49  ;;  %v566_v6 = vcombine.high %v556_v55, %v556_v55 }
 0x11a   : > { %827 = vst [vmem:[%s2049_s27 + $0x6] sm:$0x3] %v811_v63  ;;  %825 = vst [vmem:[%s2049_s27 + $0x2] sm:$0x3] %v809_v44  ;;  %v797_v4 = vmul.f32 %v2056_v35, %v691_v5  ;;  %v796_v59 = vmul.f32 %v2046_v32, %v689_v45  ;;  %v433_v63 = vcombine.high %v431_v0, %v431_v0 }
 0x11c   : > { %v813_v39 = vadd.f32 %v797_v4, %v669_v1  ;;  %v812_v44 = vadd.f32 %v796_v59, %v668_v40  ;;  %v535_v1 = vcombine.high %v533_v38, %v533_v38  ;;  %v673_v40 = vmul.f32 %v2090_v48, %v1880_v8 }
 0x11d   : > { %v695_v5 = vpop.permute.xlu1 %694  ;;  %v693_v45 = vpop.permute.xlu0 %692  ;;  %v2109_v4 = vrot.slane %v464_v30, %v1991_v49  ;;  %v2112_v59 = vrot.slane %v462_v36, %v1991_v49  ;;  %v549_v8 = vrot.slane %v533_v38, %v1984_v37  ;;  %v2135_v38 = vrot.slane %v447_v42, %v1991_v49 }
 0x11e   : > { %829 = vst [vmem:[%s2049_s27 + $0xa] sm:$0x3] %v813_v39  ;;  %828 = vst [vmem:[%s2049_s27 + $0x8] sm:$0x3] %v812_v44  ;;  %v799_v47 = vmul.f32 %v2082_v52, %v695_v5  ;;  %v798_v43 = vmul.f32 %v2085_v56, %v693_v45  ;;  %v672_v39 = vmul.f32 %v2072_v51, %v1883_v9 }
 0x11f   : > { %v461_v44 = vrot.slane %v433_v63, %v1984_v37  ;;  %v2127_v9 = vrot.slane %v566_v6, %v1991_v49  ;;  %v675_v36 = vmul.f32 %v2109_v4, %v1890_v10  ;;  %v674_v29 = vmul.f32 %v2112_v59, %v1893_v11 }
 0x120   : > { %v815_v5 = vadd.f32 %v799_v47, %v671_v2  ;;  %v814_v45 = vadd.f32 %v798_v43, %v670_v3  ;;  %v563_v3 = vrot.slane %v535_v1, %v1984_v37  ;;  %v463_v2 = vcombine.high %v447_v42, %v447_v42 }
 0x121   : > { %v699_v55 = vpop.permute.xlu1 %698  ;;  %v697_v28 = vpop.permute.xlu0 %696  ;;  %v2138_v63 = vrot.slane %v461_v44, %v1991_v49  ;;  %v2141_v37 = vrot.slane %v549_v8, %v1991_v49  ;;  %v565_v10 = vcombine.high %v549_v8, %v549_v8 }
 0x122   : > { %831 = vst [vmem:[%s2049_s27 + $0xe] sm:$0x3] %v815_v5  ;;  %830 = vst [vmem:[%s2049_s27 + $0xc] sm:$0x3] %v814_v45  ;;  %v801_v30 = vmul.f32 %v2097_v31, %v699_v55  ;;  %v800_v0 = vmul.f32 %v2100_v7, %v697_v28  ;;  %v465_v28 = vcombine.high %v461_v44, %v461_v44 }
 0x123   : > { %v2148_v42 = vrot.slane %v563_v3, %v1991_v49  ;;  %v567_v44 = vcombine.high %v563_v3, %v563_v3  ;;  %v677_v45 = vmul.f32 %v2138_v63, %v1900_v12 }
 0x124   : > { %v817_v47 = vadd.f32 %v801_v30, %v673_v40  ;;  %v816_v43 = vadd.f32 %v800_v0, %v672_v39  ;;  %v676_v40 = vmul.f32 %v2135_v38, %v1903_v13  ;;  %v2153_v39 = vrot.slane %v463_v2, %v1991_v49 }
 0x125   : > { %v703_v6 = vpop.permute.xlu1 %702  ;;  %v701_v5 = vpop.permute.xlu0 %700  ;;  %v2158_v55 = vrot.slane %v465_v28, %v1991_v49  ;;  %v2165_v12 = vrot.slane %v567_v44, %v1991_v49  ;;  %v2168_v2 = vrot.slane %v565_v10, %v1991_v49 }
 0x126   : > { %833 = vst [vmem:[%s2049_s27 + $0x12] sm:$0x3] %v817_v47  ;;  %832 = vst [vmem:[%s2049_s27 + $0x10] sm:$0x3] %v816_v43  ;;  %v803_v11 = vmul.f32 %v2127_v9, %v703_v6  ;;  %v802_v1 = vmul.f32 %v2119_v27, %v701_v5 }
 0x128   : > { %v819_v8 = vadd.f32 %v803_v11, %v675_v36  ;;  %v818_v30 = vadd.f32 %v802_v1, %v674_v29  ;;  %v679_v36 = vmul.f32 %v2158_v55, %v1910_v14  ;;  %v678_v29 = vmul.f32 %v2153_v39, %v1913_v15 }
 0x129   : > { %v707_v0 = vpop.permute.xlu1 %706  ;;  %v705_v47 = vpop.permute.xlu0 %704  ;;  %v857_v14 = vmul.f32 %v1920_v16, %v2010_v34  ;;  %v856_v15 = vmul.f32 %v1922_v17, %v2000_v58 }
 0x12a   : > { %835 = vst [vmem:[%s2049_s27 + $0x16] sm:$0x3] %v819_v8  ;;  %834 = vst [vmem:[%s2049_s27 + $0x14] sm:$0x3] %v818_v30  ;;  %v805_v13 = vmul.f32 %v2148_v42, %v707_v0  ;;  %v804_v3 = vmul.f32 %v2141_v37, %v705_v47 }
 0x12c   : > { %v821_v28 = vadd.f32 %v805_v13, %v677_v45  ;;  %v820_v43 = vadd.f32 %v804_v3, %v676_v40 }
 0x12d   : > { %v711_v6 = vpop.permute.xlu1 %710  ;;  %v709_v5 = vpop.permute.xlu0 %708 }
 0x12e   : > { %837 = vst [vmem:[%s2049_s27 + $0x1a] sm:$0x3] %v821_v28  ;;  %836 = vst [vmem:[%s2049_s27 + $0x18] sm:$0x3] %v820_v43  ;;  %v807_v49 = vmul.f32 %v2165_v12, %v711_v6  ;;  %v806_v10 = vmul.f32 %v2168_v2, %v709_v5 }
 0x130   : > { %v823_v11 = vadd.f32 %v807_v49, %v679_v36  ;;  %v822_v1 = vadd.f32 %v806_v10, %v678_v29 }
 0x131   : > { %v875_v44 = vpop.permute.xlu1 %874  ;;  %v873_v40 = vpop.permute.xlu0 %872 }
 0x132   : > { %839 = vst [vmem:[%s2049_s27 + $0x1e] sm:$0x3] %v823_v11  ;;  %838 = vst [vmem:[%s2049_s27 + $0x1c] sm:$0x3] %v822_v1  ;;  %v905_v45 = vmul.f32 %v875_v44, %v2025_v46  ;;  %v904_v8 = vmul.f32 %v873_v40, %v2007_v62 }
 0x133   : > { %1424 = shalt.err (!%p1421_p3)
}
 0x134   : > { %s1425_s17 = scalar_lea.hbm %s2185_s29, 512  ;;  %s1429_s18 = scalar_lea.hbm %s2349_s4, 1024 }
 0x135   : > { %p1426_p10 = scmp.ne.s32.totalorder %s2185_s29, %s1425_s17  ;;  %p1430_p2 = scmp.lt.u32.totalorder %s2185_s29, %s2349_s4 }
 0x136   : > { %p1431_p0 = scmp.lt.u32.totalorder %s1429_s18, %s1425_s17  ;;  %p1433_p6 = scmp.lt.u32.totalorder %s1425_s17, %s2185_s29 }
 0x137   : > { %p1427_p7 = pnand %p1426_p10, %p2412_p13 }
 0x138   : > { %p1432_p4 = por %p1431_p0, %p1430_p2 }
 0x139   : > { %p1428_p9 = pneg %p1427_p7 }
 0x13a   : > { %p1434_p11 = por %p1433_p6, %p1432_p4 }
 0x13c   : > { %p1435_p8 = pnand %p1434_p11, %p1428_p9 }
 0x13e   : > { %1438 = shalt.err (!%p1435_p8)
}
 0x13f   : > { %s1546_s16 = smov 32   ;;  %s1547_s25 = smov 2   ;;  %v859_v16 = vmul.f32 %v1928_v18, %v2019_v41  ;;  %v858_v17 = vmul.f32 %v1930_v19, %v1997_v57  ;;  %v921_v58 = vadd.f32 %v905_v45, %v857_v14  ;;  %v920_v62 = vadd.f32 %v904_v8, %v856_v15  ;;  %v879_v34 = vpop.permute.xlu1 %878  ;;  %v877_v46 = vpop.permute.xlu0 %876  ;;  %v2416_v1 = vld [vmem:[#allocation26_spill] sm:$0xff]  ;;  %v2417_v44 = vld [vmem:[#allocation27_spill] sm:$0xff] }
 0x140   : > { %1202 = dma.vmem_to_hbm [thread:$0]  (%p2412_p13), %s2187_s26, 512, %s2185_s29, %s953_s11, %s1546_s16, %s1546_s16, %s1547_s25   ;;  %v907_v30 = vmul.f32 %v879_v34, %v2032_v50  ;;  %v906_v0 = vmul.f32 %v877_v46, %v2004_v61  ;;  %v861_v18 = vmul.f32 %v1936_v20, %v2038_v53  ;;  %v860_v19 = vmul.f32 %v1938_v21, %v2041_v54 }
 0x141   : > { %s2229_s24 = scalar_lea.vmem [#allocation10], %s1830_s6  ;;  %v863_v61 = vmul.f32 %v1944_v22, %v2068_v60  ;;  %v862_v20 = vmul.f32 %v1946_v23, %v2061_v33  ;;  %v864_v22 = vmul.f32 %v1954_v25, %v2072_v51  ;;  %s2418_s26 = sld [smem:[#allocation30_spill]] }
 0x142   : > { %937 = vst [vmem:[%s2229_s24 + $0x2] sm:$0x3] %v921_v58  ;;  %936 = vst [vmem:[%s2229_s24] sm:$0x3] %v920_v62  ;;  %v923_v57 = vadd.f32 %v907_v30, %v859_v16  ;;  %v922_v41 = vadd.f32 %v906_v0, %v858_v17  ;;  %s991_s6 = sshll.u32 %s2229_s24, 4  ;;  %s958_s2 = scalar_lea.sflag [#allocation11], %s1827_s14  ;;  %s2291_s6 = int_to_ptr.vmem [resolvable:$true] %s991_s6 }
 0x143   : > { %v883_v47 = vpop.permute.xlu1 %882  ;;  %v881_v13 = vpop.permute.xlu0 %880  ;;  %s1439_s29 = scalar_lea.vmem %s2291_s6, 512  ;;  %s1548_s11 = smov [#allocation10]  }
 0x144   : > { %939 = vst [vmem:[%s2229_s24 + $0x6] sm:$0x3] %v923_v57  ;;  %938 = vst [vmem:[%s2229_s24 + $0x4] sm:$0x3] %v922_v41  ;;  %v909_v3 = vmul.f32 %v883_v47, %v2056_v35  ;;  %v908_v50 = vmul.f32 %v881_v13, %v2046_v32  ;;  %v865_v32 = vmul.f32 %v1952_v24, %v2090_v48  ;;  %v2413_v24 = vld [vmem:[#allocation23_spill] sm:$0xff]  ;;  %p1440_p12 = scmp.ne.s32.totalorder %s2291_s6, %s1439_s29  ;;  %s1443_s21 = sshll.u32 %s1548_s11, 4  ;;  %s1444_s21 = int_to_ptr.vmem [resolvable:$false] %s1443_s21 }
 0x145   : > { %v866_v48 = vmul.f32 %v2413_v24, %v2112_v59  ;;  %s1445_s9 = scalar_lea.vmem %s1444_s21, 1024  ;;  %p1446_p3 = scmp.lt.s32.totalorder %s2291_s6, %s1444_s21 }
 0x146   : > { %v925_v21 = vadd.f32 %v909_v3, %v861_v18  ;;  %v924_v53 = vadd.f32 %v908_v50, %v860_v19  ;;  %p1441_p1 = pnand %p1440_p12, %p2412_p13  ;;  %p1447_p10 = scmp.lt.s32.totalorder %s1445_s9, %s1439_s29 }
 0x147   : > { %v887_v54 = vpop.permute.xlu1 %886  ;;  %v885_v36 = vpop.permute.xlu0 %884  ;;  %s2289_s0 = scalar_lea.hbm %s2418_s26, %s1188_s8 }
 0x148   : > { %941 = vst [vmem:[%s2229_s24 + $0xa] sm:$0x3] %v925_v21  ;;  %940 = vst [vmem:[%s2229_s24 + $0x8] sm:$0x3] %v924_v53  ;;  %v911_v29 = vmul.f32 %v887_v54, %v2082_v52  ;;  %v910_v35 = vmul.f32 %v885_v36, %v2085_v56  ;;  %v867_v56 = vmul.f32 %v1960_v26, %v2109_v4  ;;  %v2415_v26 = vld [vmem:[#allocation25_spill] sm:$0xff]  ;;  %p1442_p5 = pneg %p1441_p1  ;;  %p1448_p7 = por %p1447_p10, %p1446_p3 }
 0x149   : > { %v868_v4 = vmul.f32 %v2415_v26, %v2135_v38  ;;  %v870_v38 = vmul.f32 %v2417_v44, %v2153_v39 }
 0x14a   : > { %v927_v23 = vadd.f32 %v911_v29, %v863_v61  ;;  %v926_v33 = vadd.f32 %v910_v35, %v862_v20  ;;  %p1449_p9 = pnand %p1448_p7, %p1442_p5 }
 0x14b   : > { %v891_v60 = vpop.permute.xlu1 %890  ;;  %v889_v28 = vpop.permute.xlu0 %888 }
 0x14c   : > { %943 = vst [vmem:[%s2229_s24 + $0xe] sm:$0x3] %v927_v23  ;;  %942 = vst [vmem:[%s2229_s24 + $0xc] sm:$0x3] %v926_v33  ;;  %v913_v43 = vmul.f32 %v891_v60, %v2097_v31  ;;  %v912_v52 = vmul.f32 %v889_v28, %v2100_v7  ;;  %v2414_v7 = vld [vmem:[#allocation24_spill] sm:$0xff] }
 0x14d   : > { %v869_v10 = vmul.f32 %v2414_v7, %v2138_v63  ;;  %v871_v63 = vmul.f32 %v2416_v1, %v2158_v55 }
 0x14e   : > { %v929_v25 = vadd.f32 %v913_v43, %v865_v32  ;;  %v928_v51 = vadd.f32 %v912_v52, %v864_v22 }
 0x14f   : > { %v895_v6 = vpop.permute.xlu1 %894  ;;  %v893_v5 = vpop.permute.xlu0 %892 }
 0x150   : > { %945 = vst [vmem:[%s2229_s24 + $0x12] sm:$0x3] %v929_v25  ;;  %944 = vst [vmem:[%s2229_s24 + $0x10] sm:$0x3] %v928_v51  ;;  %v915_v49 = vmul.f32 %v895_v6, %v2127_v9  ;;  %v914_v31 = vmul.f32 %v893_v5, %v2119_v27 }
 0x152   : > { %v931_v59 = vadd.f32 %v915_v49, %v867_v56  ;;  %v930_v14 = vadd.f32 %v914_v31, %v866_v48 }
 0x153   : > { %v899_v15 = vpop.permute.xlu1 %898  ;;  %v897_v11 = vpop.permute.xlu0 %896 }
 0x154   : > { %947 = vst [vmem:[%s2229_s24 + $0x16] sm:$0x3] %v931_v59  ;;  %946 = vst [vmem:[%s2229_s24 + $0x14] sm:$0x3] %v930_v14  ;;  %v917_v9 = vmul.f32 %v899_v15, %v2148_v42  ;;  %v916_v27 = vmul.f32 %v897_v11, %v2141_v37 }
 0x156   : > { %v933_v40 = vadd.f32 %v917_v9, %v869_v10  ;;  %v932_v45 = vadd.f32 %v916_v27, %v868_v4 }
 0x157   : > { %v903_v8 = vpop.permute.xlu1 %902  ;;  %v901_v16 = vpop.permute.xlu0 %900 }
 0x158   : > { %949 = vst [vmem:[%s2229_s24 + $0x1a] sm:$0x3] %v933_v40  ;;  %948 = vst [vmem:[%s2229_s24 + $0x18] sm:$0x3] %v932_v45  ;;  %v919_v42 = vmul.f32 %v903_v8, %v2165_v12  ;;  %v918_v37 = vmul.f32 %v901_v16, %v2168_v2 }
 0x15a   : > { %v935_v17 = vadd.f32 %v919_v42, %v871_v63  ;;  %v934_v58 = vadd.f32 %v918_v37, %v870_v38 }
 0x15c   : > { %951 = vst [vmem:[%s2229_s24 + $0x1e] sm:$0x3] %v935_v17  ;;  %950 = vst [vmem:[%s2229_s24 + $0x1c] sm:$0x3] %v934_v58 }
 0x15d   : > { %1452 = shalt.err (!%p1449_p9)
}
 0x15e   : > { %s1453_s8 = scalar_lea.hbm %s2289_s0, 512  ;;  %s1457_s15 = scalar_lea.hbm %s2418_s26, 1024 }
 0x15f   : > { %p1454_p2 = scmp.ne.s32.totalorder %s2289_s0, %s1453_s8  ;;  %p1458_p6 = scmp.lt.u32.totalorder %s2289_s0, %s2418_s26 }
 0x160   : > { %p1459_p11 = scmp.lt.u32.totalorder %s1457_s15, %s1453_s8  ;;  %p1461_p12 = scmp.lt.u32.totalorder %s1453_s8, %s2289_s0 }
 0x161   : > { %p1455_p0 = pnand %p1454_p2, %p2412_p13 }
 0x162   : > { %p1460_p8 = por %p1459_p11, %p1458_p6 }
 0x163   : > { %p1456_p4 = pneg %p1455_p0 }
 0x164   : > { %p1462_p1 = por %p1461_p12, %p1460_p8 }
 0x166   : > { %p1463_p5 = pnand %p1462_p1, %p1456_p4 }
 0x168   : > { %1466 = shalt.err (!%p1463_p5)
}
 0x169   : > { %1203 = dma.vmem_to_hbm [thread:$0]  (%p2412_p13), %s2291_s6, 512, %s2289_s0, %s958_s2, %s1546_s16, %s1546_s16, %s1547_s25  }
 0x16a PF: > { %s2419_s30 = sld [smem:[#allocation17_spill]]  ;;  %s2420_s18 = sld [smem:[#allocation20_spill]] }
 0x16b   : > { %p2422_p10 = scmp.ge.s32.totalorder %s1533_s23, 2 }
 0x170   : > { %s1006_s12 = sand.u32 1, %s2419_s30   ;;  %p2421_p3 = scmp.ne.s32.totalorder %s2420_s18, 0 }
 0x171   : > { %s1007_s10 = scalar_lea.sflag [#allocation4], %s1006_s12 }
 0x172   : > { %p1221_p7 = pnand %p2422_p10, %p2421_p3 }
 0x174   : > { %1504 = dma.done.wait (!%p1221_p7), %s1007_s10, 512  }
 0x175   : > { %1506 = vsyncadd (!%p1221_p7), %s1007_s10, 4294966784  ;;  %s1016_s20 = scalar_lea.sflag [#allocation11], %s1006_s12 }
 0x176   : > { %1508 = dma.done.wait (!%p1221_p7), %s1016_s20, 512  }
 0x177   : > { %1510 = vsyncadd (!%p1221_p7), %s1016_s20, 4294966784  ;;  %s24_s23 = sadd.s32 1, %s1533_s23   ;;  %s2423_s14 = sld [smem:[#allocation18_spill]] }
 0x178   : > { %p21_p9 = scmp.ge.s32.totalorder %s24_s23, 4   ;;  %s2424_s20 = sld [smem:[#allocation22_spill]] }
 0x179   : > { %s2425_s16 = sld [smem:[#allocation21_spill]]  ;;  %s2426_s18 = smov %s1517_s19 }
 0x17a   : > { %s2428_s21 = smov %s1529_s22  ;;  %23 = sbr.rel (!%p21_p9) target bundleno = 12 (0xc), region = 118 }
 0x17d   : > { %s2427_s19 = smov %s2423_s14 }
 0x17f   : > { %s2429_s22 = smov %s2425_s16 }
 0x181   :  { %1021 = vsyncpa [#allocation3], 1 }
 0x182   :  { %1023 = vsyncpa [#allocation3 + $0x1], 1 }
 0x183   :  { %1024 = vsyncpa [#allocation6], 1 }
 0x184   :  { %1025 = vsyncpa [#allocation4], 1 }
 0x185   :  { %1027 = vsyncpa [#allocation4 + $0x1], 1 }
 0x186   :  { %1028 = vsyncpa [#allocation11], 1 }
 0x187   :  { %1030 = vsyncpa [#allocation11 + $0x1], 1 }

</bundles_post_ra>
